<compile_context>
chip_gen: v6e
topology: v6e:2x2x1
jax: 0.10.0
libtpu: 0.0.40
codegen_flags: <defaults>
</compile_context>

<pallas_src>
import functools

import jax
import jax.numpy as jnp
from jax.experimental import pallas as pl
from jax.experimental.pallas import tpu as pltpu


def _round_up(x, m):
    return ((x + m - 1) // m) * m


def schrodinger_pinn_kernel(xt_ref,
                            w1_ref, b1_ref,
                            w2_ref, b2_ref,
                            w3_ref, b3_ref,
                            o_ref):
    """One batch tile. Activations are (features, TILE_M): batch on lanes."""
    x = xt_ref[...]                          # (input_dim, TILE_M)
    w1 = w1_ref[...]                         # (hidden, input_dim)
    w2 = w2_ref[...]                         # (hidden, hidden)
    w3 = w3_ref[...]                         # (output_dim, hidden)

    # (hidden, 1) / (output_dim, 1) biases: rely on implicit broadcasting at
    # each add — never materialize a (hidden, tile_m) splat (vreg pressure).
    b1 = b1_ref[...]
    b2 = b2_ref[...]
    b3 = b3_ref[...]

    hp = jax.lax.Precision.HIGHEST

    # Layer 1: small-K MXU matmul (the MXU is idle otherwise).
    h = jnp.tanh(jnp.dot(w1, x, preferred_element_type=jnp.float32,
                         precision=hp) + b1)

    # Layers 2-4: l2 applied three times with shared weights (as in PyTorch).
    for _ in range(3):
        h = jnp.tanh(jnp.dot(w2, h, preferred_element_type=jnp.float32,
                             precision=hp) + b2)

    # Layer 5: l3 + tanh, lane-dense store.
    h = jnp.tanh(jnp.dot(w3, h, preferred_element_type=jnp.float32,
                         precision=hp) + b3)
    o_ref[...] = h.astype(o_ref.dtype)


@functools.partial(jax.jit, static_argnames=("tile_m",))
def schrodinger_pinn_forward(x, t, params, tile_m=8192):
    """x, t: (N, input_dim) float32.  Returns (N, 2 * output_dim) float32."""
    w1, b1, w2, b2, w3, b3 = params          # PyTorch layout: w (out, in), b (out, 1)
    n, input_dim = x.shape
    hidden = w1.shape[0]
    output_dim = w3.shape[0]

    # Fuse the two passes: stack x and t on the batch axis, then transpose so
    # the batch rides the 128-lane axis (lane-dense activations and stores).
    xt = jnp.concatenate([x, t], axis=0).T              # (input_dim, 2N)
    total = 2 * n

    # Pick the batch tile: as large as requested (multiple of 128), but when
    # the batch is big enough prefer >= 2 grid steps so v7x can shard the
    # 1-D "parallel" grid across its 2 TensorCores.
    tile = min(tile_m, _round_up(total, 128))
    if tile > 128 and _round_up(total, tile) // tile < 2:
        half = max(128, _round_up((total + 1) // 2, 128))
        tile = min(tile, half)
    padded = _round_up(total, tile)
    if padded != total:
        xt = jnp.pad(xt, ((0, 0), (0, padded - total)))

    grid = (padded // tile,)

    out = pl.pallas_call(
        schrodinger_pinn_kernel,
        out_shape=jax.ShapeDtypeStruct((output_dim, padded), jnp.float32),
        grid=grid,
        in_specs=[
            pl.BlockSpec((input_dim, tile), lambda i: (0, i)),     # stacked x/t tile
            pl.BlockSpec((hidden, input_dim), lambda i: (0, 0)),   # w1 (resident)
            pl.BlockSpec((hidden, 1), lambda i: (0, 0)),           # b1
            pl.BlockSpec((hidden, hidden), lambda i: (0, 0)),      # w2
            pl.BlockSpec((hidden, 1), lambda i: (0, 0)),           # b2
            pl.BlockSpec((output_dim, hidden), lambda i: (0, 0)),  # w3
            pl.BlockSpec((output_dim, 1), lambda i: (0, 0)),       # b3
        ],
        out_specs=pl.BlockSpec((output_dim, tile), lambda i: (0, i)),
        compiler_params=pltpu.CompilerParams(
            dimension_semantics=("parallel",),
        ),
    )(xt, w1, b1, w2, b2, w3, b3)

    out = out[:, :total]                                 # (output_dim, 2N)
    out_x = out[:, :n].T                                 # (N, output_dim)
    out_t = out[:, n:].T                                 # (N, output_dim)
    return jnp.concatenate([out_x, out_t], axis=1)       # torch.cat(..., dim=1)


def init_params(key, input_dim, hidden_dim, output_dim):
    """nn.Linear default init U(-1/sqrt(fan_in), 1/sqrt(fan_in)); PyTorch layout."""
    ks = jax.random.split(key, 6)

    def lin(kw, kb, fan_in, fan_out):
        bound = 1.0 / float(fan_in) ** 0.5
        w = jax.random.uniform(kw, (fan_out, fan_in), jnp.float32, -bound, bound)
        b = jax.random.uniform(kb, (fan_out, 1), jnp.float32, -bound, bound)
        return w, b

    w1, b1 = lin(ks[0], ks[1], input_dim, hidden_dim)
    w2, b2 = lin(ks[2], ks[3], hidden_dim, hidden_dim)
    w3, b3 = lin(ks[4], ks[5], hidden_dim, output_dim)
    return (w1, b1, w2, b2, w3, b3)


def reference_forward(x, t, params):
    """Pure-JAX reference matching SchrodingerPINN.forward."""
    w1, b1, w2, b2, w3, b3 = params

    def mlp(h):
        h = jnp.tanh(h @ w1.T + b1[:, 0])
        for _ in range(3):                   # l2 applied three times, shared weights
            h = jnp.tanh(h @ w2.T + b2[:, 0])
        return jnp.tanh(h @ w3.T + b3[:, 0])

    return jnp.concatenate([mlp(x), mlp(t)], axis=1)


if __name__ == "__main__":
    input_dim, hidden_dim, output_dim = 2, 32, 2
    batch = 8

    key = jax.random.PRNGKey(0)
    kx, kt, kp = jax.random.split(key, 3)

    x = jax.random.normal(kx, (batch, input_dim), jnp.float32)
    t = jax.random.normal(kt, (batch, input_dim), jnp.float32)
    params = init_params(kp, input_dim, hidden_dim, output_dim)

    out = schrodinger_pinn_forward(x, t, params)
    out = jax.block_until_ready(out)

    ref = reference_forward(x, t, params)
    assert out.shape == (batch, 2 * output_dim), out.shape
    err = float(jnp.max(jnp.abs(out - ref)))
    assert jnp.allclose(out, ref, atol=1e-4, rtol=1e-4), f"mismatch vs reference: {err}"

    print("KERNEL_OK")
</pallas_src>

<mosaic_0001>
module attributes {stable_mosaic.version = 11 : i64} {
  func.func @schrodinger_pinn_kernel(%arg0: i32, %arg1: memref<2x128xf32, #tpu.memory_space<vmem>>, %arg2: memref<32x2xf32, #tpu.memory_space<vmem>>, %arg3: memref<32x1xf32, #tpu.memory_space<vmem>>, %arg4: memref<32x32xf32, #tpu.memory_space<vmem>>, %arg5: memref<32x1xf32, #tpu.memory_space<vmem>>, %arg6: memref<2x32xf32, #tpu.memory_space<vmem>>, %arg7: memref<2x1xf32, #tpu.memory_space<vmem>>, %arg8: memref<2x128xf32, #tpu.memory_space<vmem>>) attributes {dimension_semantics = [#tpu.dimension_semantics<parallel>], iteration_bounds = array<i64: 1>, scalar_prefetch = 0 : i64, scratch_operands = 0 : i64, tpu.core_type = #tpu.core_type<tc>, window_params = [{transform_indices = @transform_0, window_bounds = array<i64: 2, 128>}, {pipeline_mode = #tpu.pipeline_mode<synchronous>, transform_indices = @transform_1, window_bounds = array<i64: 32, 2>}, {pipeline_mode = #tpu.pipeline_mode<synchronous>, transform_indices = @transform_2, window_bounds = array<i64: 32, 1>}, {pipeline_mode = #tpu.pipeline_mode<synchronous>, transform_indices = @transform_3, window_bounds = array<i64: 32, 32>}, {pipeline_mode = #tpu.pipeline_mode<synchronous>, transform_indices = @transform_4, window_bounds = array<i64: 32, 1>}, {pipeline_mode = #tpu.pipeline_mode<synchronous>, transform_indices = @transform_5, window_bounds = array<i64: 2, 32>}, {pipeline_mode = #tpu.pipeline_mode<synchronous>, transform_indices = @transform_6, window_bounds = array<i64: 2, 1>}, {transform_indices = @transform_7, window_bounds = array<i64: 2, 128>}]} {
    %c0 = arith.constant 0 : index
    %c0_0 = arith.constant 0 : index
    %0 = vector.load %arg1[%c0, %c0_0] : memref<2x128xf32, #tpu.memory_space<vmem>>, vector<2x128xf32>
    %c0_1 = arith.constant 0 : index
    %c0_2 = arith.constant 0 : index
    %1 = vector.load %arg2[%c0_1, %c0_2] : memref<32x2xf32, #tpu.memory_space<vmem>>, vector<32x2xf32>
    %c0_3 = arith.constant 0 : index
    %c0_4 = arith.constant 0 : index
    %2 = vector.load %arg4[%c0_3, %c0_4] : memref<32x32xf32, #tpu.memory_space<vmem>>, vector<32x32xf32>
    %c0_5 = arith.constant 0 : index
    %c0_6 = arith.constant 0 : index
    %3 = vector.load %arg6[%c0_5, %c0_6] : memref<2x32xf32, #tpu.memory_space<vmem>>, vector<2x32xf32>
    %c0_7 = arith.constant 0 : index
    %c0_8 = arith.constant 0 : index
    %4 = vector.load %arg3[%c0_7, %c0_8] : memref<32x1xf32, #tpu.memory_space<vmem>>, vector<32x1xf32>
    %c0_9 = arith.constant 0 : index
    %c0_10 = arith.constant 0 : index
    %5 = vector.load %arg5[%c0_9, %c0_10] : memref<32x1xf32, #tpu.memory_space<vmem>>, vector<32x1xf32>
    %c0_11 = arith.constant 0 : index
    %c0_12 = arith.constant 0 : index
    %6 = vector.load %arg7[%c0_11, %c0_12] : memref<2x1xf32, #tpu.memory_space<vmem>>, vector<2x1xf32>
    %cst = arith.constant dense<0.000000e+00> : vector<32x128xf32>
    %7 = tpu.matmul %1, %0, %cst {dimension_numbers = #tpu.dot_dimension_numbers<[1], [0], [0], [1], [0, 0, 1, 1], [], []>, precision = #tpu.contract_precision<fp32>} : vector<32x2xf32>, vector<2x128xf32>, vector<32x128xf32> -> vector<32x128xf32>
    %8 = vector.broadcast %4 : vector<32x1xf32> to vector<32x128xf32>
    %9 = arith.addf %7, %8 : vector<32x128xf32>
    %10 = math.tanh %9 : vector<32x128xf32>
    %cst_13 = arith.constant dense<0.000000e+00> : vector<32x128xf32>
    %11 = tpu.matmul %2, %10, %cst_13 {dimension_numbers = #tpu.dot_dimension_numbers<[1], [0], [0], [1], [0, 0, 1, 1], [], []>, precision = #tpu.contract_precision<fp32>} : vector<32x32xf32>, vector<32x128xf32>, vector<32x128xf32> -> vector<32x128xf32>
    %12 = vector.broadcast %5 : vector<32x1xf32> to vector<32x128xf32>
    %13 = arith.addf %11, %12 : vector<32x128xf32>
    %14 = math.tanh %13 : vector<32x128xf32>
    %cst_14 = arith.constant dense<0.000000e+00> : vector<32x128xf32>
    %15 = tpu.matmul %2, %14, %cst_14 {dimension_numbers = #tpu.dot_dimension_numbers<[1], [0], [0], [1], [0, 0, 1, 1], [], []>, precision = #tpu.contract_precision<fp32>} : vector<32x32xf32>, vector<32x128xf32>, vector<32x128xf32> -> vector<32x128xf32>
    %16 = vector.broadcast %5 : vector<32x1xf32> to vector<32x128xf32>
    %17 = arith.addf %15, %16 : vector<32x128xf32>
    %18 = math.tanh %17 : vector<32x128xf32>
    %cst_15 = arith.constant dense<0.000000e+00> : vector<32x128xf32>
    %19 = tpu.matmul %2, %18, %cst_15 {dimension_numbers = #tpu.dot_dimension_numbers<[1], [0], [0], [1], [0, 0, 1, 1], [], []>, precision = #tpu.contract_precision<fp32>} : vector<32x32xf32>, vector<32x128xf32>, vector<32x128xf32> -> vector<32x128xf32>
    %20 = vector.broadcast %5 : vector<32x1xf32> to vector<32x128xf32>
    %21 = arith.addf %19, %20 : vector<32x128xf32>
    %22 = math.tanh %21 : vector<32x128xf32>
    %cst_16 = arith.constant dense<0.000000e+00> : vector<2x128xf32>
    %23 = tpu.matmul %3, %22, %cst_16 {dimension_numbers = #tpu.dot_dimension_numbers<[1], [0], [0], [1], [0, 0, 1, 1], [], []>, precision = #tpu.contract_precision<fp32>} : vector<2x32xf32>, vector<32x128xf32>, vector<2x128xf32> -> vector<2x128xf32>
    %24 = vector.broadcast %6 : vector<2x1xf32> to vector<2x128xf32>
    %25 = arith.addf %23, %24 : vector<2x128xf32>
    %26 = math.tanh %25 : vector<2x128xf32>
    %c0_17 = arith.constant 0 : index
    %c0_18 = arith.constant 0 : index
    %27 = vector.load %arg8[%c0_17, %c0_18] : memref<2x128xf32, #tpu.memory_space<vmem>>, vector<2x128xf32>
    tpu.vector_store %arg8[%c0_17, %c0_18], %26 {strides = array<i32>} : memref<2x128xf32, #tpu.memory_space<vmem>>, vector<2x128xf32>,
    return
  }
  func.func @transform_0(%arg0: i32) -> (i32, i32) {
    %c0_i32 = arith.constant 0 : i32
    %c0_i32_0 = arith.constant 0 : i32
    return %c0_i32, %arg0 : i32, i32
  }
  func.func @transform_1(%arg0: i32) -> (i32, i32) {
    %c0_i32 = arith.constant 0 : i32
    %c0_i32_0 = arith.constant 0 : i32
    %c0_i32_1 = arith.constant 0 : i32
    return %c0_i32, %c0_i32_0 : i32, i32
  }
  func.func @transform_2(%arg0: i32) -> (i32, i32) {
    %c0_i32 = arith.constant 0 : i32
    %c0_i32_0 = arith.constant 0 : i32
    %c0_i32_1 = arith.constant 0 : i32
    return %c0_i32, %c0_i32_0 : i32, i32
  }
  func.func @transform_3(%arg0: i32) -> (i32, i32) {
    %c0_i32 = arith.constant 0 : i32
    %c0_i32_0 = arith.constant 0 : i32
    %c0_i32_1 = arith.constant 0 : i32
    return %c0_i32, %c0_i32_0 : i32, i32
  }
  func.func @transform_4(%arg0: i32) -> (i32, i32) {
    %c0_i32 = arith.constant 0 : i32
    %c0_i32_0 = arith.constant 0 : i32
    %c0_i32_1 = arith.constant 0 : i32
    return %c0_i32, %c0_i32_0 : i32, i32
  }
  func.func @transform_5(%arg0: i32) -> (i32, i32) {
    %c0_i32 = arith.constant 0 : i32
    %c0_i32_0 = arith.constant 0 : i32
    %c0_i32_1 = arith.constant 0 : i32
    return %c0_i32, %c0_i32_0 : i32, i32
  }
  func.func @transform_6(%arg0: i32) -> (i32, i32) {
    %c0_i32 = arith.constant 0 : i32
    %c0_i32_0 = arith.constant 0 : i32
    %c0_i32_1 = arith.constant 0 : i32
    return %c0_i32, %c0_i32_0 : i32, i32
  }
  func.func @transform_7(%arg0: i32) -> (i32, i32) {
    %c0_i32 = arith.constant 0 : i32
    %c0_i32_0 = arith.constant 0 : i32
    return %c0_i32, %arg0 : i32, i32
  }
}

</mosaic_0001>

<bundles_post_ra>
// kernel: schrodinger_pinn_forward.1
= control target key start
LH: loop header
LB: loop body
LE: loop exit
PB: predicated region body
PF: predicated region fallthrough
CT: control target
= control target key end

     0   :  { %vm78_vm0 = vcmask 1041408   ;;  %vm65_vm1 = vcmask 15360   ;;  %v3656_v3 = vmov 0   ;;  %vm681_vm2 = vcmask 261120   ;;  %s4124_s0 = inlined_call_operand.vmem [shape: f32[2,128], index: 0, kind: input, shape index: {}]   ;;  %s4125_s1 = inlined_call_operand.vmem [shape: f32[32,2], index: 1, kind: input, shape index: {}]   ;;  %s4126_s2 = inlined_call_operand.vmem [shape: f32[32,1], index: 2, kind: input, shape index: {}]   ;;  %s4127_s4 = inlined_call_operand.vmem [shape: f32[32,1], index: 4, kind: input, shape index: {}]   ;;  %s4128_s6 = inlined_call_operand.vmem [shape: f32[2,1], index: 6, kind: input, shape index: {}]   ;;  %s4129_s3 = inlined_call_operand.vmem [shape: f32[32,32], index: 3, kind: input, shape index: {}]   ;;  %s4130_s5 = inlined_call_operand.vmem [shape: f32[2,32], index: 5, kind: input, shape index: {}]   ;;  %s4131_s7 = inlined_call_operand.vmem [shape: f32[2,128], index: 7, kind: output, shape index: {}]  }
   0x1   :  { %v26_v0 = vld [vmem:[%s4124_s0] sm:$0x3]  ;;  %v28_v2 = vld [vmem:[%s4125_s1 + $0x8] sm:$0xff]  ;;  %3620 = vset.pattern.permute.xlu0 %v3656_v3  ;;  %3621 = vset.pattern.permute.xlu1 %v3656_v3  ;;  %v29_v7 = vld [vmem:[%s4125_s1 + $0x10] sm:$0xff]  ;;  %vm3658_vm3 = vmmov 0  }
   0x2   :  { %v27_v1 = vld [vmem:[%s4125_s1] sm:$0xff]  ;;  %v80_v4 = vsel %vm78_vm0, %v26_v0, 0  ;;  %v70_v6 = vsel %vm65_vm1, %v28_v2, 0  ;;  %v30_v8 = vld [vmem:[%s4125_s1 + $0x18] sm:$0xff]  ;;  %v73_v13 = vsel %vm65_vm1, %v29_v7, 0  ;;  %v37_v14 = vld [vmem:[%s4126_s2 + $0x8] sm:$0xff] }
   0x3   :  { %v67_v5 = vsel %vm65_vm1, %v27_v1, 0  ;;  %v39_v9 = vld [vmem:[%s4126_s2 + $0x18] sm:$0xff]  ;;  %v3719_v10 = vand.u32 4294901760, %v80_v4  ;;  %v3723_v12 = vand.u32 4294901760, %v70_v6  ;;  %v3729_v15 = vand.u32 4294901760, %v73_v13  ;;  %v38_v17 = vld [vmem:[%s4126_s2 + $0x10] sm:$0xff]  ;;  %52 = vperm.xlu1 %3621, %v37_v14  }
   0x4   :  { %v3721_v11 = vand.u32 4294901760, %v67_v5  ;;  %62 = vperm.xlu0 %3620, %v39_v9   ;;  %v76_v16 = vsel %vm65_vm1, %v30_v8, 0  ;;  %v36_v22 = vld [vmem:[%s4126_s2] sm:$0xff]  ;;  %v43_v29 = vld [vmem:[%s4127_s4 + $0x18] sm:$0xff]  ;;  %v42_v34 = vld [vmem:[%s4127_s4 + $0x10] sm:$0xff] }
   0x5   :  { %3251 = vmatprep.subr.mxu0 %v3719_v10  ;;  %v220_v19 = vsub.f32 %v80_v4, %v3719_v10  ;;  %v159_v20 = vsub.f32 %v70_v6, %v3723_v12  ;;  %v3740_v21 = vand.u32 4294901760, %v76_v16  ;;  %v169_v23 = vsub.f32 %v73_v13, %v3729_v15  ;;  %v41_v42 = vld [vmem:[%s4127_s4 + $0x8] sm:$0xff]  ;;  %v40_v43 = vld [vmem:[%s4127_s4] sm:$0xff] }
   0x6   :  { %v149_v18 = vsub.f32 %v67_v5, %v3721_v11  ;;  %3261 = vmatprep.mubr.f32.mxu1 %v3721_v11  ;;  %3252 = vmatpush3.msra.mxu0 %v3719_v10  ;;  %v44_v44 = vld [vmem:[%s4128_s6] sm:$0x3] }
   0x7   :  { %v221_v25 = vand.u32 4294901760, %v220_v19  ;;  %v160_v26 = vand.u32 4294901760, %v159_v20  ;;  %3267 = vmatprep.subr.mxu0 %v220_v19  ;;  %v179_v27 = vsub.f32 %v76_v16, %v3740_v21  ;;  %v170_v28 = vand.u32 4294901760, %v169_v23  ;;  %47 = vperm.xlu1 %3621, %v36_v22   ;;  %v31_v45 = vld [vmem:[%s4129_s3] sm:$0xff] }
   0x8   :  { %v150_v24 = vand.u32 4294901760, %v149_v18  ;;  %57 = vperm.xlu0 %3620, %v38_v17   ;;  %v683_v46 = vsel %vm681_vm2, %v31_v45, 0 }
   0x9   :  { %v222_v31 = vsub.f32 %v220_v19, %v221_v25  ;;  %v161_v32 = vsub.f32 %v159_v20, %v160_v26  ;;  %v180_v33 = vand.u32 4294901760, %v179_v27  ;;  %v171_v35 = vsub.f32 %v169_v23, %v170_v28 }
   0xa   :  { %v151_v30 = vsub.f32 %v149_v18, %v150_v24  ;;  %v3782_v47 = vand.u32 4294901760, %v683_v46 }
   0xb   :  { %v223_v37 = vand.u32 4294901760, %v222_v31  ;;  %v162_v38 = vand.u32 4294901760, %v161_v32  ;;  %v181_v39 = vsub.f32 %v179_v27, %v180_v33  ;;  %v172_v40 = vand.u32 4294901760, %v171_v35  ;;  %673 = vperm.xlu1 %3621, %v42_v34  }
   0xc   :  { %v152_v36 = vand.u32 4294901760, %v151_v30  ;;  %678 = vperm.xlu0 %3620, %v43_v29   ;;  %v3785_v48 = vsub.f32 %v683_v46, %v3782_v47 }
   0xd   :  { %3259 = vmatprep.subr.mxu1 %v223_v37  ;;  %v182_v41 = vand.u32 4294901760, %v181_v39  ;;  %v32_v39 = vld [vmem:[%s4129_s3 + $0x8] sm:$0xff] }
   0xe   :  { %3253 = vmatprep.mubr.f32.mxu0 %v152_v36  ;;  %3260 = vmatpush3.msra.mxu1 %v223_v37  ;;  %v3789_v49 = vand.u32 4294901760, %v3785_v48 }
   0xf   :  { %3254 = vmatmul.mubr.f32.vlgmr.msra.gmra.mxu0 %v162_v38  ;;  %3262 = vmatmul.mubr.f32.vlgmr.msra.gmra.mxu1 %v3723_v12 }
  0x10   :  { %3268 = vmatpush3.msra.mxu0 %v220_v19  ;;  %3275 = vmatprep.subr.mxu1 %v3719_v10  ;;  %v766_v50 = vsub.f32 %v3785_v48, %v3789_v49 }
  0x11   :  { %3256 = vmatprep.mubr.f32.mxu0 %v172_v40  ;;  %3276 = vmatpush3.msra.mxu1 %v3719_v10 }
  0x12   :  { %3264 = vmatprep.mubr.f32.mxu1 %v3729_v15  ;;  %3283 = vmatprep.subr.mxu0 %v221_v25  ;;  %v3793_v51 = vand.u32 4294901760, %v766_v50 }
  0x13   :  { %3257 = vmatmul.mubr.f32.gmra.mxu0 %v182_v41  ;;  %3265 = vmatmul.mubr.f32.gmra.mxu1 %v3740_v21  ;;  %v686_v41 = vsel %vm681_vm2, %v32_v39, 0 }
  0x14   :  { %3269 = vmatprep.mubr.f32.mxu0 %v149_v18  ;;  %3277 = vmatprep.mubr.f32.mxu1 %v150_v24 }
  0x15   :  { %3291 = vmatprep.subr.mxu1 %v3719_v10  ;;  %668 = vperm.xlu0 %3620, %v41_v42   ;;  %v33_v42 = vld [vmem:[%s4129_s3 + $0x10] sm:$0xff] }
  0x16   :  { %663 = vperm.xlu1 %3621, %v40_v43   ;;  %v34_v43 = vld [vmem:[%s4129_s3 + $0x18] sm:$0xff]  ;;  %v689_v45 = vsel %vm681_vm2, %v33_v42, 0 }
  0x17   :  { %3270 = vmatmul.mubr.f32.vlgmr.msra.gmra.mxu0 %v159_v20  ;;  %3278 = vmatmul.mubr.f32.vlgmr.msra.gmra.mxu1 %v160_v26  ;;  %v692_v46 = vsel %vm681_vm2, %v34_v43, 0  ;;  %v3810_v50 = vand.u32 4294901760, %v689_v45 }
  0x18   :  { %3284 = vmatpush3.msra.mxu0 %v221_v25  ;;  %3272 = vmatprep.mubr.f32.mxu0 %v169_v23 }
  0x19   :  { %3292 = vmatpush3.msra.mxu1 %v3719_v10  ;;  %3280 = vmatprep.mubr.f32.mxu1 %v170_v28 }
  0x1a   :  { %2550 = vperm.xlu0 %3620, %v44_v44   ;;  %v3806_v44 = vand.u32 4294901760, %v686_v41 }
  0x1b   :  { %3273 = vmatmul.mubr.f32.gmra.mxu0 %v179_v27  ;;  %3281 = vmatmul.mubr.f32.gmra.mxu1 %v180_v33 }
  0x1c   :  { %3285 = vmatprep.mubr.f32.mxu0 %v3721_v11  ;;  %3293 = vmatprep.mubr.f32.mxu1 %v3721_v11 }
  0x1f   :  { %3286 = vmatmul.mubr.f32.vlgmr.msra.gmra.mxu0 %v3723_v12  ;;  %3294 = vmatmul.mubr.f32.vlgmr.msra.gmra.mxu1 %v3723_v12 }
  0x20   :  { %3288 = vmatprep.mubr.f32.mxu0 %v3729_v15  ;;  %3296 = vmatprep.mubr.f32.mxu1 %v3729_v15 }
  0x23   :  { %3289 = vmatmul.mubr.f32.gmra.mxu0 %v3740_v21  ;;  %3297 = vmatmul.mubr.f32.gmra.mxu1 %v3740_v21 }
  0x24   :  { %3321 = vmatprep.mubr.f32.mxu1 %v3782_v47  ;;  %3307 = vmatprep.mubr.f32.mxu0 %v3793_v51 }
  0x7e   :  { %v53_v52 = vpop.permute.xlu1 %52 }
  0x7f   :  { %v63_v56 = vpop.permute.xlu0 %62 }
  0x82   :  { %v48_v58 = vpop.permute.xlu1 %47 }
  0x83   :  { %v58_v5 = vpop.permute.xlu0 %57 }
  0xcf   :  { %v3255_v53 = vpop.f32.mrf.mxu0  ;;  %v3263_v54 = vpop.f32.mrf.mxu1 }
  0xd0   :  { %v165_v60 = vadd.f32 %v3255_v53, %v53_v52  ;;  %v3813_v52 = vsub.f32 %v686_v41, %v3806_v44 }
  0xd1   :  { %v154_v55 = vpop.f32.mrf.mxu0  ;;  %v260_v57 = vpop.f32.mrf.mxu1 }
  0xd2   :  { %v155_v63 = vadd.f32 %v154_v55, %v48_v58  ;;  %v267_v2 = vadd.f32 %v3263_v54, %v165_v60  ;;  %v3815_v54 = vand.u32 4294901760, %v692_v46  ;;  %v3823_v58 = vand.u32 4294901760, %v3813_v52 }
  0xd3   :  { %v3258_v59 = vpop.f32.mrf.mxu0  ;;  %v3266_v61 = vpop.f32.mrf.mxu1 }
  0xd4   :  { %v185_v3 = vadd.f32 %v3258_v59, %v63_v56  ;;  %v261_v7 = vadd.f32 %v260_v57, %v155_v63  ;;  %v3820_v57 = vsub.f32 %v689_v45, %v3810_v50 }
  0xd5   :  { %v174_v62 = vpop.f32.mrf.mxu0  ;;  %v272_v0 = vpop.f32.mrf.mxu1 }
  0xd6   :  { %v175_v8 = vadd.f32 %v174_v62, %v58_v5  ;;  %v279_v12 = vadd.f32 %v3266_v61, %v185_v3  ;;  %v3828_v61 = vsub.f32 %v692_v46, %v3815_v54  ;;  %v776_v3 = vsub.f32 %v3813_v52, %v3823_v58 }
  0xd7   :  { %v3271_v1 = vpop.f32.mrf.mxu0  ;;  %v3279_v4 = vpop.f32.mrf.mxu1 }
  0xd8   :  { %v360_v9 = vadd.f32 %v3271_v1, %v267_v2  ;;  %v273_v16 = vadd.f32 %v272_v0, %v175_v8  ;;  %v3833_v0 = vand.u32 4294901760, %v3820_v57  ;;  %v3844_v5 = vand.u32 4294901760, %v3828_v61 }
  0xd9   :  { %v352_v6 = vpop.f32.mrf.mxu0  ;;  %v447_v10 = vpop.f32.mrf.mxu1 }
  0xda   :  { %v353_v13 = vadd.f32 %v352_v6, %v261_v7  ;;  %v456_v17 = vadd.f32 %v3279_v4, %v360_v9  ;;  %v786_v9 = vsub.f32 %v3820_v57, %v3833_v0 }
  0xdb   :  { %v3274_v11 = vpop.f32.mrf.mxu0  ;;  %v3282_v14 = vpop.f32.mrf.mxu1 }
  0xdc   :  { %v374_v18 = vadd.f32 %v3274_v11, %v279_v12  ;;  %v448_v21 = vadd.f32 %v447_v10, %v353_v13  ;;  %v3853_v11 = vand.u32 4294901760, %v776_v3 }
  0xdd   :  { %v366_v15 = vpop.f32.mrf.mxu0  ;;  %v463_v19 = vpop.f32.mrf.mxu1 }
  0xde   :  { %v367_v22 = vadd.f32 %v366_v15, %v273_v16  ;;  %v472_v26 = vadd.f32 %v3282_v14, %v374_v18  ;;  %v796_v14 = vsub.f32 %v3828_v61, %v3844_v5  ;;  %v3860_v18 = vand.u32 4294901760, %v786_v9 }
  0xdf   :  { %v3287_v20 = vpop.f32.mrf.mxu0  ;;  %v3295_v24 = vpop.f32.mrf.mxu1 }
  0xe0   :  { %v552_v23 = vadd.f32 %v3287_v20, %v456_v17  ;;  %v464_v31 = vadd.f32 %v463_v19, %v367_v22 }
  0xe1   :  { %v545_v25 = vpop.f32.mrf.mxu0  ;;  %v635_v29 = vpop.f32.mrf.mxu1 }
  0xe2   :  { %v642_v27 = vadd.f32 %v3295_v24, %v552_v23  ;;  %v546_v28 = vadd.f32 %v545_v25, %v448_v21  ;;  %v3863_v21 = vand.u32 4294901760, %v796_v14 }
  0xe3   :  { %v3290_v30 = vpop.f32.mrf.mxu0  ;;  %v3298_v34 = vpop.f32.mrf.mxu1 }
  0xe4   :  { %3622 = vtanh.f32 %v642_v27  ;;  %v636_v32 = vadd.f32 %v635_v29, %v546_v28  ;;  %v564_v33 = vadd.f32 %v3290_v30, %v472_v26  ;;  %v3904_v30 = vpop.permute.xlu0 %678 }
  0xe5   :  { %v557_v35 = vpop.f32.mrf.mxu0  ;;  %v647_v38 = vpop.f32.mrf.mxu1 }
  0xe6   :  { %3624 = vtanh.f32 %v636_v32  ;;  %v654_v36 = vadd.f32 %v3298_v34, %v564_v33  ;;  %v558_v37 = vadd.f32 %v557_v35, %v464_v31  ;;  %v3906_v33 = vpop.permute.xlu1 %673 }
  0xe8   :  { %3626 = vtanh.f32 %v654_v36  ;;  %v648_v40 = vadd.f32 %v647_v38, %v558_v37  ;;  %v3908_v36 = vpop.permute.xlu0 %668 }
  0xea   :  { %3628 = vtanh.f32 %v648_v40  ;;  %v3911_v39 = vpop.permute.xlu1 %663 }
  0xf1   :  { %v3623_v53 = vpop.eup %3622 }
  0xf2   :  { %v3817_v56 = vand.u32 4294901760, %v3623_v53 }
  0xf3   :  { %v3625_v55 = vpop.eup %3624 }
  0xf4   :  { %v3825_v60 = vand.u32 4294901760, %v3625_v55  ;;  %v843_v1 = vsub.f32 %v3623_v53, %v3817_v56 }
  0xf5   :  { %v3627_v59 = vpop.eup %3626 }
  0xf6   :  { %v3830_v62 = vand.u32 4294901760, %v3627_v59  ;;  %v850_v6 = vsub.f32 %v3625_v55, %v3825_v60  ;;  %v844_v10 = vand.u32 4294901760, %v843_v1 }
  0xf7   :  { %v3629_v63 = vpop.eup %3628 }
  0xf8   :  { %v3836_v2 = vand.u32 4294901760, %v3629_v63  ;;  %3299 = vmatprep.subr.mxu0 %v3830_v62  ;;  %v829_v4 = vsub.f32 %v3627_v59, %v3830_v62  ;;  %v851_v15 = vand.u32 4294901760, %v850_v6  ;;  %v845_v19 = vsub.f32 %v843_v1, %v844_v10 }
  0xf9   :  { %3300 = vmatpush3.msra.mxu0 %v3830_v62 }
  0xfa   :  { %3301 = vmatprep.subr.mxu0 %v3836_v2  ;;  %v830_v7 = vand.u32 4294901760, %v829_v4  ;;  %v836_v8 = vsub.f32 %v3629_v63, %v3836_v2  ;;  %v852_v22 = vsub.f32 %v850_v6, %v851_v15  ;;  %v846_v23 = vand.u32 4294901760, %v845_v19 }
  0xfb   :  { %3302 = vmatpush3.msra.mxu0 %v3836_v2 }
  0xfc   :  { %3303 = vmatprep.subr.mxu0 %v3817_v56  ;;  %v831_v12 = vsub.f32 %v829_v4, %v830_v7  ;;  %v837_v13 = vand.u32 4294901760, %v836_v8  ;;  %v853_v24 = vand.u32 4294901760, %v852_v22 }
  0xfd   :  { %3304 = vmatpush3.msra.mxu0 %v3817_v56 }
  0xfe   :  { %3305 = vmatprep.subr.mxu0 %v3825_v60  ;;  %v832_v16 = vand.u32 4294901760, %v831_v12  ;;  %v838_v17 = vsub.f32 %v836_v8, %v837_v13 }
  0xff   :  { %3306 = vmatpush3.msra.mxu0 %v3825_v60 }
 0x100   :  { %3308 = vmatmul.mubr.f32.vlgmr.msra.gmra.mxu0 %v3853_v11  ;;  %3313 = vmatprep.subr.mxu1 %v832_v16  ;;  %v839_v20 = vand.u32 4294901760, %v838_v17 }
 0x101   :  { %3327 = vmatprep.subr.mxu0 %v829_v4  ;;  %3314 = vmatpush3.msra.mxu1 %v832_v16 }
 0x102   :  { %3328 = vmatpush3.msra.mxu0 %v829_v4  ;;  %3315 = vmatprep.subr.mxu1 %v839_v20 }
 0x103   :  { %3329 = vmatprep.subr.mxu0 %v836_v8  ;;  %3310 = vmatprep.mubr.f32.mxu0 %v3860_v18 }
 0x104   :  { %3316 = vmatpush3.msra.mxu1 %v839_v20  ;;  %3330 = vmatpush3.msra.mxu0 %v836_v8 }
 0x105   :  { %3311 = vmatmul.mubr.f32.gmra.mxu0 %v3863_v21  ;;  %3317 = vmatprep.subr.mxu1 %v846_v23 }
 0x106   :  { %3331 = vmatprep.subr.mxu0 %v843_v1  ;;  %3318 = vmatpush3.msra.mxu1 %v846_v23 }
 0x107   :  { %3332 = vmatpush3.msra.mxu0 %v843_v1  ;;  %3319 = vmatprep.subr.mxu1 %v853_v24 }
 0x108   :  { %3333 = vmatprep.subr.mxu0 %v850_v6  ;;  %3320 = vmatpush3.msra.mxu1 %v853_v24 }
 0x109   :  { %3334 = vmatpush3.msra.mxu0 %v850_v6  ;;  %3322 = vmatmul.mubr.f32.vlgmr.msra.gmra.mxu1 %v3806_v44 }
 0x10a   :  { %3335 = vmatprep.mubr.f32.mxu0 %v3785_v48  ;;  %3341 = vmatprep.subr.mxu1 %v3830_v62 }
 0x10b   :  { %3355 = vmatprep.subr.mxu0 %v830_v7  ;;  %3336 = vmatmul.mubr.f32.vlgmr.msra.gmra.mxu0 %v3813_v52 }
 0x10c   :  { %3342 = vmatpush3.msra.mxu1 %v3830_v62  ;;  %3356 = vmatpush3.msra.mxu0 %v830_v7 }
 0x10d   :  { %3343 = vmatprep.subr.mxu1 %v3836_v2  ;;  %3357 = vmatprep.subr.mxu0 %v837_v13 }
 0x10e   :  { %3324 = vmatprep.mubr.f32.mxu1 %v3810_v50  ;;  %3344 = vmatpush3.msra.mxu1 %v3836_v2 }
 0x10f   :  { %3358 = vmatpush3.msra.mxu0 %v837_v13  ;;  %3325 = vmatmul.mubr.f32.gmra.mxu1 %v3815_v54 }
 0x110   :  { %3345 = vmatprep.subr.mxu1 %v3817_v56  ;;  %3359 = vmatprep.subr.mxu0 %v844_v10 }
 0x111   :  { %3338 = vmatprep.mubr.f32.mxu0 %v3820_v57  ;;  %3346 = vmatpush3.msra.mxu1 %v3817_v56 }
 0x112   :  { %3360 = vmatpush3.msra.mxu0 %v844_v10  ;;  %3347 = vmatprep.subr.mxu1 %v3825_v60 }
 0x113   :  { %3339 = vmatmul.mubr.f32.gmra.mxu0 %v3828_v61  ;;  %3361 = vmatprep.subr.mxu0 %v851_v15 }
 0x114   :  { %3348 = vmatpush3.msra.mxu1 %v3825_v60  ;;  %3349 = vmatprep.mubr.f32.mxu1 %v3789_v49 }
 0x115   :  { %3362 = vmatpush3.msra.mxu0 %v851_v15  ;;  %3350 = vmatmul.mubr.f32.vlgmr.msra.gmra.mxu1 %v3823_v58 }
 0x116   :  { %3369 = vmatprep.subr.mxu1 %v3830_v62  ;;  %3363 = vmatprep.mubr.f32.mxu0 %v3782_v47 }
 0x117   :  { %3370 = vmatpush3.msra.mxu1 %v3830_v62  ;;  %3364 = vmatmul.mubr.f32.vlgmr.msra.gmra.mxu0 %v3806_v44 }
 0x118   :  { %3371 = vmatprep.subr.mxu1 %v3836_v2  ;;  %3352 = vmatprep.mubr.f32.mxu1 %v3833_v0 }
 0x119   :  { %3372 = vmatpush3.msra.mxu1 %v3836_v2  ;;  %3366 = vmatprep.mubr.f32.mxu0 %v3810_v50 }
 0x11a   :  { %3353 = vmatmul.mubr.f32.gmra.mxu1 %v3844_v5  ;;  %3373 = vmatprep.subr.mxu1 %v3817_v56 }
 0x11b   :  { %3374 = vmatpush3.msra.mxu1 %v3817_v56  ;;  %3367 = vmatmul.mubr.f32.gmra.mxu0 %v3815_v54 }
 0x11c   :  { %3375 = vmatprep.subr.mxu1 %v3825_v60  ;;  %3377 = vmatprep.mubr.f32.mxu1 %v3782_v47 }
 0x11d   :  { %3376 = vmatpush3.msra.mxu1 %v3825_v60  ;;  %3391 = vmatprep.mubr.f32.mxu0 %v3793_v51 }
 0x11e   :  { %3378 = vmatmul.mubr.f32.vlgmr.msra.gmra.mxu1 %v3806_v44 }
 0x11f   :  { %3380 = vmatprep.mubr.f32.mxu1 %v3810_v50 }
 0x122   :  { %3381 = vmatmul.mubr.f32.gmra.mxu1 %v3815_v54 }
 0x123   :  { %3405 = vmatprep.mubr.f32.mxu1 %v3782_v47 }
 0x1c0   :  { %v3309_v25 = vpop.f32.mrf.mxu0 }
 0x1c1   :  { %v780_v37 = vadd.f32 %v3309_v25, %v3908_v36 }
 0x1c2   :  { %v769_v26 = vpop.f32.mrf.mxu0 }
 0x1c3   :  { %v770_v40 = vadd.f32 %v769_v26, %v3911_v39 }
 0x1c5   :  { %v3312_v27 = vpop.f32.mrf.mxu0 }
 0x1c6   :  { %v800_v43 = vadd.f32 %v3312_v27, %v3904_v30 }
 0x1c7   :  { %v789_v28 = vpop.f32.mrf.mxu0 }
 0x1c8   :  { %v790_v55 = vadd.f32 %v789_v28, %v3906_v33 }
 0x1c9   :  { %v3323_v29 = vpop.f32.mrf.mxu1 }
 0x1ca   :  { %v897_v41 = vadd.f32 %v3323_v29, %v780_v37 }
 0x1cb   :  { %v890_v31 = vpop.f32.mrf.mxu1  ;;  %v3337_v32 = vpop.f32.mrf.mxu0 }
 0x1cc   :  { %v891_v45 = vadd.f32 %v890_v31, %v770_v40  ;;  %v996_v56 = vadd.f32 %v3337_v32, %v897_v41 }
 0x1cd   :  { %v988_v35 = vpop.f32.mrf.mxu0 }
 0x1ce   :  { %v989_v63 = vadd.f32 %v988_v35, %v891_v45 }
 0x1cf   :  { %v3326_v34 = vpop.f32.mrf.mxu1 }
 0x1d0   :  { %v909_v59 = vadd.f32 %v3326_v34, %v800_v43 }
 0x1d1   :  { %v902_v38 = vpop.f32.mrf.mxu1 }
 0x1d2   :  { %v903_v1 = vadd.f32 %v902_v38, %v790_v55 }
 0x1d3   :  { %v3340_v42 = vpop.f32.mrf.mxu0 }
 0x1d4   :  { %v1010_v6 = vadd.f32 %v3340_v42, %v909_v59 }
 0x1d5   :  { %v1002_v46 = vpop.f32.mrf.mxu0  ;;  %v3351_v53 = vpop.f32.mrf.mxu1 }
 0x1d6   :  { %v1095_v2 = vadd.f32 %v3351_v53, %v996_v56  ;;  %v1003_v10 = vadd.f32 %v1002_v46, %v903_v1 }
 0x1d7   :  { %v1086_v60 = vpop.f32.mrf.mxu1  ;;  %v3365_v62 = vpop.f32.mrf.mxu0 }
 0x1d8   :  { %v1087_v7 = vadd.f32 %v1086_v60, %v989_v63  ;;  %v1200_v12 = vadd.f32 %v3365_v62, %v1095_v2 }
 0x1d9   :  { %v1193_v3 = vpop.f32.mrf.mxu0 }
 0x1da   :  { %v3354_v4 = vpop.f32.mrf.mxu1  ;;  %v1194_v15 = vadd.f32 %v1193_v3, %v1087_v7 }
 0x1db   :  { %v3368_v9 = vpop.f32.mrf.mxu0  ;;  %v1111_v13 = vadd.f32 %v3354_v4, %v1010_v6 }
 0x1dc   :  { %v1102_v8 = vpop.f32.mrf.mxu1 }
 0x1dd   :  { %v1103_v16 = vadd.f32 %v1102_v8, %v1003_v10  ;;  %v1205_v19 = vpop.f32.mrf.mxu0  ;;  %v1212_v22 = vadd.f32 %v3368_v9, %v1111_v13 }
 0x1de   :  { %v3379_v14 = vpop.f32.mrf.mxu1 }
 0x1df   :  { %v1293_v17 = vadd.f32 %v3379_v14, %v1200_v12  ;;  %v1206_v25 = vadd.f32 %v1205_v19, %v1103_v16 }
 0x1e0   :  { %v1286_v20 = vpop.f32.mrf.mxu1 }
 0x1e1   :  { %3630 = vtanh.f32 %v1293_v17  ;;  %v1287_v23 = vadd.f32 %v1286_v20, %v1194_v15 }
 0x1e2   :  { %v3382_v24 = vpop.f32.mrf.mxu1 }
 0x1e3   :  { %3632 = vtanh.f32 %v1287_v23  ;;  %v1305_v26 = vadd.f32 %v3382_v24, %v1212_v22 }
 0x1e4   :  { %v1298_v27 = vpop.f32.mrf.mxu1 }
 0x1e5   :  { %3634 = vtanh.f32 %v1305_v26  ;;  %v1299_v28 = vadd.f32 %v1298_v27, %v1206_v25 }
 0x1e7   :  { %3636 = vtanh.f32 %v1299_v28 }
 0x1ee   :  { %v3631_v29 = vpop.eup %3630 }
 0x1ef   :  { %v3916_v32 = vand.u32 4294901760, %v3631_v29 }
 0x1f0   :  { %v3633_v31 = vpop.eup %3632 }
 0x1f1   :  { %v3918_v35 = vand.u32 4294901760, %v3633_v31  ;;  %v1461_v40 = vsub.f32 %v3631_v29, %v3916_v32 }
 0x1f2   :  { %v3635_v34 = vpop.eup %3634 }
 0x1f3   :  { %v3920_v37 = vand.u32 4294901760, %v3635_v34  ;;  %v1468_v43 = vsub.f32 %v3633_v31, %v3918_v35  ;;  %v1462_v53 = vand.u32 4294901760, %v1461_v40 }
 0x1f4   :  { %v3637_v38 = vpop.eup %3636 }
 0x1f5   :  { %v3923_v41 = vand.u32 4294901760, %v3637_v38  ;;  %3383 = vmatprep.subr.mxu0 %v3920_v37  ;;  %v1447_v42 = vsub.f32 %v3635_v34, %v3920_v37  ;;  %v1469_v59 = vand.u32 4294901760, %v1468_v43  ;;  %v1463_v63 = vsub.f32 %v1461_v40, %v1462_v53 }
 0x1f6   :  { %3384 = vmatpush3.msra.mxu0 %v3920_v37 }
 0x1f7   :  { %3385 = vmatprep.subr.mxu0 %v3923_v41  ;;  %v1448_v45 = vand.u32 4294901760, %v1447_v42  ;;  %v1454_v46 = vsub.f32 %v3637_v38, %v3923_v41  ;;  %v1470_v2 = vsub.f32 %v1468_v43, %v1469_v59  ;;  %v1464_v3 = vand.u32 4294901760, %v1463_v63 }
 0x1f8   :  { %3386 = vmatpush3.msra.mxu0 %v3923_v41 }
 0x1f9   :  { %3387 = vmatprep.subr.mxu0 %v3916_v32  ;;  %v1449_v55 = vsub.f32 %v1447_v42, %v1448_v45  ;;  %v1455_v56 = vand.u32 4294901760, %v1454_v46  ;;  %v1471_v4 = vand.u32 4294901760, %v1470_v2 }
 0x1fa   :  { %3388 = vmatpush3.msra.mxu0 %v3916_v32 }
 0x1fb   :  { %3389 = vmatprep.subr.mxu0 %v3918_v35  ;;  %v1450_v60 = vand.u32 4294901760, %v1449_v55  ;;  %v1456_v62 = vsub.f32 %v1454_v46, %v1455_v56 }
 0x1fc   :  { %3390 = vmatpush3.msra.mxu0 %v3918_v35 }
 0x1fd   :  { %3392 = vmatmul.mubr.f32.vlgmr.msra.gmra.mxu0 %v3853_v11  ;;  %3397 = vmatprep.subr.mxu1 %v1450_v60  ;;  %v1457_v1 = vand.u32 4294901760, %v1456_v62 }
 0x1fe   :  { %3411 = vmatprep.subr.mxu0 %v1447_v42  ;;  %3398 = vmatpush3.msra.mxu1 %v1450_v60 }
 0x1ff   :  { %3412 = vmatpush3.msra.mxu0 %v1447_v42  ;;  %3399 = vmatprep.subr.mxu1 %v1457_v1 }
 0x200   :  { %3413 = vmatprep.subr.mxu0 %v1454_v46  ;;  %3394 = vmatprep.mubr.f32.mxu0 %v3860_v18 }
 0x201   :  { %3400 = vmatpush3.msra.mxu1 %v1457_v1  ;;  %3414 = vmatpush3.msra.mxu0 %v1454_v46 }
 0x202   :  { %3395 = vmatmul.mubr.f32.gmra.mxu0 %v3863_v21  ;;  %3401 = vmatprep.subr.mxu1 %v1464_v3 }
 0x203   :  { %3415 = vmatprep.subr.mxu0 %v1461_v40  ;;  %3402 = vmatpush3.msra.mxu1 %v1464_v3 }
 0x204   :  { %3416 = vmatpush3.msra.mxu0 %v1461_v40  ;;  %3403 = vmatprep.subr.mxu1 %v1471_v4 }
 0x205   :  { %3417 = vmatprep.subr.mxu0 %v1468_v43  ;;  %3404 = vmatpush3.msra.mxu1 %v1471_v4 }
 0x206   :  { %3418 = vmatpush3.msra.mxu0 %v1468_v43  ;;  %3406 = vmatmul.mubr.f32.vlgmr.msra.gmra.mxu1 %v3806_v44 }
 0x207   :  { %3419 = vmatprep.mubr.f32.mxu0 %v3785_v48  ;;  %3425 = vmatprep.subr.mxu1 %v3920_v37 }
 0x208   :  { %3439 = vmatprep.subr.mxu0 %v1448_v45  ;;  %3420 = vmatmul.mubr.f32.vlgmr.msra.gmra.mxu0 %v3813_v52 }
 0x209   :  { %3426 = vmatpush3.msra.mxu1 %v3920_v37  ;;  %3440 = vmatpush3.msra.mxu0 %v1448_v45 }
 0x20a   :  { %3427 = vmatprep.subr.mxu1 %v3923_v41  ;;  %3441 = vmatprep.subr.mxu0 %v1455_v56 }
 0x20b   :  { %3408 = vmatprep.mubr.f32.mxu1 %v3810_v50  ;;  %3428 = vmatpush3.msra.mxu1 %v3923_v41 }
 0x20c   :  { %3442 = vmatpush3.msra.mxu0 %v1455_v56  ;;  %3409 = vmatmul.mubr.f32.gmra.mxu1 %v3815_v54 }
 0x20d   :  { %3429 = vmatprep.subr.mxu1 %v3916_v32  ;;  %3443 = vmatprep.subr.mxu0 %v1462_v53 }
 0x20e   :  { %3422 = vmatprep.mubr.f32.mxu0 %v3820_v57  ;;  %3430 = vmatpush3.msra.mxu1 %v3916_v32 }
 0x20f   :  { %3444 = vmatpush3.msra.mxu0 %v1462_v53  ;;  %3431 = vmatprep.subr.mxu1 %v3918_v35 }
 0x210   :  { %3423 = vmatmul.mubr.f32.gmra.mxu0 %v3828_v61  ;;  %3445 = vmatprep.subr.mxu0 %v1469_v59 }
 0x211   :  { %3432 = vmatpush3.msra.mxu1 %v3918_v35  ;;  %3433 = vmatprep.mubr.f32.mxu1 %v3789_v49 }
 0x212   :  { %3446 = vmatpush3.msra.mxu0 %v1469_v59  ;;  %3434 = vmatmul.mubr.f32.vlgmr.msra.gmra.mxu1 %v3823_v58 }
 0x213   :  { %3453 = vmatprep.subr.mxu1 %v3920_v37  ;;  %3447 = vmatprep.mubr.f32.mxu0 %v3782_v47 }
 0x214   :  { %3454 = vmatpush3.msra.mxu1 %v3920_v37  ;;  %3448 = vmatmul.mubr.f32.vlgmr.msra.gmra.mxu0 %v3806_v44 }
 0x215   :  { %3455 = vmatprep.subr.mxu1 %v3923_v41  ;;  %3436 = vmatprep.mubr.f32.mxu1 %v3833_v0 }
 0x216   :  { %3456 = vmatpush3.msra.mxu1 %v3923_v41  ;;  %3450 = vmatprep.mubr.f32.mxu0 %v3810_v50 }
 0x217   :  { %3437 = vmatmul.mubr.f32.gmra.mxu1 %v3844_v5  ;;  %3457 = vmatprep.subr.mxu1 %v3916_v32 }
 0x218   :  { %3458 = vmatpush3.msra.mxu1 %v3916_v32  ;;  %3451 = vmatmul.mubr.f32.gmra.mxu0 %v3815_v54 }
 0x219   :  { %3459 = vmatprep.subr.mxu1 %v3918_v35  ;;  %3461 = vmatprep.mubr.f32.mxu1 %v3782_v47 }
 0x21a   :  { %3460 = vmatpush3.msra.mxu1 %v3918_v35  ;;  %3475 = vmatprep.mubr.f32.mxu0 %v3793_v51 }
 0x21b   :  { %3462 = vmatmul.mubr.f32.vlgmr.msra.gmra.mxu1 %v3806_v44 }
 0x21c   :  { %3464 = vmatprep.mubr.f32.mxu1 %v3810_v50 }
 0x21f   :  { %3465 = vmatmul.mubr.f32.gmra.mxu1 %v3815_v54 }
 0x220   :  { %3489 = vmatprep.mubr.f32.mxu1 %v3782_v47 }
 0x2bd   :  { %v3393_v6 = vpop.f32.mrf.mxu0 }
 0x2be   :  { %v1398_v16 = vadd.f32 %v3393_v6, %v3908_v36 }
 0x2bf   :  { %v1387_v7 = vpop.f32.mrf.mxu0 }
 0x2c0   :  { %v1388_v17 = vadd.f32 %v1387_v7, %v3911_v39 }
 0x2c2   :  { %v3396_v8 = vpop.f32.mrf.mxu0 }
 0x2c3   :  { %v1418_v22 = vadd.f32 %v3396_v8, %v3904_v30 }
 0x2c4   :  { %v1407_v9 = vpop.f32.mrf.mxu0 }
 0x2c5   :  { %v1408_v26 = vadd.f32 %v1407_v9, %v3906_v33 }
 0x2c6   :  { %v3407_v10 = vpop.f32.mrf.mxu1 }
 0x2c7   :  { %v1515_v19 = vadd.f32 %v3407_v10, %v1398_v16 }
 0x2c8   :  { %v1508_v12 = vpop.f32.mrf.mxu1  ;;  %v3421_v13 = vpop.f32.mrf.mxu0 }
 0x2c9   :  { %v1509_v23 = vadd.f32 %v1508_v12, %v1388_v17  ;;  %v1614_v27 = vadd.f32 %v3421_v13, %v1515_v19 }
 0x2ca   :  { %v1606_v15 = vpop.f32.mrf.mxu0 }
 0x2cb   :  { %v1607_v32 = vadd.f32 %v1606_v15, %v1509_v23 }
 0x2cc   :  { %v3410_v14 = vpop.f32.mrf.mxu1 }
 0x2cd   :  { %v1527_v28 = vadd.f32 %v3410_v14, %v1418_v22 }
 0x2ce   :  { %v1520_v51 = vpop.f32.mrf.mxu1 }
 0x2cf   :  { %v1521_v34 = vadd.f32 %v1520_v51, %v1408_v26 }
 0x2d0   :  { %v3424_v20 = vpop.f32.mrf.mxu0 }
 0x2d1   :  { %v1628_v40 = vadd.f32 %v3424_v20, %v1527_v28 }
 0x2d2   :  { %v1620_v24 = vpop.f32.mrf.mxu0  ;;  %v3435_v25 = vpop.f32.mrf.mxu1 }
 0x2d3   :  { %v1713_v35 = vadd.f32 %v3435_v25, %v1614_v27  ;;  %v1621_v45 = vadd.f32 %v1620_v24, %v1521_v34 }
 0x2d4   :  { %v1704_v29 = vpop.f32.mrf.mxu1  ;;  %v3449_v31 = vpop.f32.mrf.mxu0 }
 0x2d5   :  { %v1705_v41 = vadd.f32 %v1704_v29, %v1607_v32  ;;  %v1818_v46 = vadd.f32 %v3449_v31, %v1713_v35 }
 0x2d6   :  { %v1811_v37 = vpop.f32.mrf.mxu0 }
 0x2d7   :  { %v3438_v38 = vpop.f32.mrf.mxu1  ;;  %v1812_v56 = vadd.f32 %v1811_v37, %v1705_v41 }
 0x2d8   :  { %v3452_v43 = vpop.f32.mrf.mxu0  ;;  %v1729_v53 = vadd.f32 %v3438_v38, %v1628_v40 }
 0x2d9   :  { %v1720_v42 = vpop.f32.mrf.mxu1 }
 0x2da   :  { %v1721_v59 = vadd.f32 %v1720_v42, %v1621_v45  ;;  %v1823_v62 = vpop.f32.mrf.mxu0  ;;  %v1830_v1 = vadd.f32 %v3452_v43, %v1729_v53 }
 0x2db   :  { %v3463_v55 = vpop.f32.mrf.mxu1 }
 0x2dc   :  { %v1911_v60 = vadd.f32 %v3463_v55, %v1818_v46  ;;  %v1824_v4 = vadd.f32 %v1823_v62, %v1721_v59 }
 0x2dd   :  { %v1904_v63 = vpop.f32.mrf.mxu1 }
 0x2de   :  { %3638 = vtanh.f32 %v1911_v60  ;;  %v1905_v2 = vadd.f32 %v1904_v63, %v1812_v56 }
 0x2df   :  { %v3466_v3 = vpop.f32.mrf.mxu1 }
 0x2e0   :  { %3640 = vtanh.f32 %v1905_v2  ;;  %v1923_v6 = vadd.f32 %v3466_v3, %v1830_v1 }
 0x2e1   :  { %v1916_v7 = vpop.f32.mrf.mxu1 }
 0x2e2   :  { %3642 = vtanh.f32 %v1923_v6  ;;  %v1917_v8 = vadd.f32 %v1916_v7, %v1824_v4 }
 0x2e4   :  { %3644 = vtanh.f32 %v1917_v8 }
 0x2eb   :  { %v3639_v9 = vpop.eup %3638 }
 0x2ec   :  { %v3980_v12 = vand.u32 4294901760, %v3639_v9 }
 0x2ed   :  { %v3641_v10 = vpop.eup %3640 }
 0x2ee   :  { %v3982_v14 = vand.u32 4294901760, %v3641_v10  ;;  %v2079_v51 = vsub.f32 %v3639_v9, %v3980_v12 }
 0x2ef   :  { %v3643_v13 = vpop.eup %3642 }
 0x2f0   :  { %v3984_v15 = vand.u32 4294901760, %v3643_v13  ;;  %v2086_v20 = vsub.f32 %v3641_v10, %v3982_v14  ;;  %v2080_v24 = vand.u32 4294901760, %v2079_v51 }
 0x2f1   :  { %v3645_v16 = vpop.eup %3644 }
 0x2f2   :  { %v3987_v17 = vand.u32 4294901760, %v3645_v16  ;;  %3467 = vmatprep.subr.mxu0 %v3984_v15  ;;  %v2065_v19 = vsub.f32 %v3643_v13, %v3984_v15  ;;  %v2087_v27 = vand.u32 4294901760, %v2086_v20  ;;  %v2081_v31 = vsub.f32 %v2079_v51, %v2080_v24 }
 0x2f3   :  { %3468 = vmatpush3.msra.mxu0 %v3984_v15 }
 0x2f4   :  { %3469 = vmatprep.subr.mxu0 %v3987_v17  ;;  %v2066_v22 = vand.u32 4294901760, %v2065_v19  ;;  %v2072_v23 = vsub.f32 %v3645_v16, %v3987_v17  ;;  %v2088_v34 = vsub.f32 %v2086_v20, %v2087_v27  ;;  %v2082_v35 = vand.u32 4294901760, %v2081_v31 }
 0x2f5   :  { %3470 = vmatpush3.msra.mxu0 %v3987_v17 }
 0x2f6   :  { %3471 = vmatprep.subr.mxu0 %v3980_v12  ;;  %v2067_v25 = vsub.f32 %v2065_v19, %v2066_v22  ;;  %v2073_v26 = vand.u32 4294901760, %v2072_v23  ;;  %v2089_v37 = vand.u32 4294901760, %v2088_v34 }
 0x2f7   :  { %3472 = vmatpush3.msra.mxu0 %v3980_v12 }
 0x2f8   :  { %3473 = vmatprep.subr.mxu0 %v3982_v14  ;;  %v2068_v28 = vand.u32 4294901760, %v2067_v25  ;;  %v2074_v29 = vsub.f32 %v2072_v23, %v2073_v26 }
 0x2f9   :  { %3474 = vmatpush3.msra.mxu0 %v3982_v14 }
 0x2fa   :  { %3476 = vmatmul.mubr.f32.vlgmr.msra.gmra.mxu0 %v3853_v11  ;;  %3481 = vmatprep.subr.mxu1 %v2068_v28  ;;  %v2075_v32 = vand.u32 4294901760, %v2074_v29 }
 0x2fb   :  { %3495 = vmatprep.subr.mxu0 %v2065_v19  ;;  %3482 = vmatpush3.msra.mxu1 %v2068_v28 }
 0x2fc   :  { %3496 = vmatpush3.msra.mxu0 %v2065_v19  ;;  %3483 = vmatprep.subr.mxu1 %v2075_v32 }
 0x2fd   :  { %3497 = vmatprep.subr.mxu0 %v2072_v23  ;;  %3478 = vmatprep.mubr.f32.mxu0 %v3860_v18 }
 0x2fe   :  { %3484 = vmatpush3.msra.mxu1 %v2075_v32  ;;  %3498 = vmatpush3.msra.mxu0 %v2072_v23 }
 0x2ff   :  { %3479 = vmatmul.mubr.f32.gmra.mxu0 %v3863_v21  ;;  %3485 = vmatprep.subr.mxu1 %v2082_v35 }
 0x300   :  { %3499 = vmatprep.subr.mxu0 %v2079_v51  ;;  %3486 = vmatpush3.msra.mxu1 %v2082_v35 }
 0x301   :  { %3500 = vmatpush3.msra.mxu0 %v2079_v51  ;;  %3487 = vmatprep.subr.mxu1 %v2089_v37 }
 0x302   :  { %3501 = vmatprep.subr.mxu0 %v2086_v20  ;;  %3488 = vmatpush3.msra.mxu1 %v2089_v37 }
 0x303   :  { %3502 = vmatpush3.msra.mxu0 %v2086_v20  ;;  %3490 = vmatmul.mubr.f32.vlgmr.msra.gmra.mxu1 %v3806_v44 }
 0x304   :  { %3503 = vmatprep.mubr.f32.mxu0 %v3785_v48  ;;  %3509 = vmatprep.subr.mxu1 %v3984_v15  ;;  %v3657_v48 = vmov 0.0  }
 0x305   :  { %3523 = vmatprep.subr.mxu0 %v2066_v22  ;;  %3504 = vmatmul.mubr.f32.vlgmr.msra.gmra.mxu0 %v3813_v52 }
 0x306   :  { %3510 = vmatpush3.msra.mxu1 %v3984_v15  ;;  %3524 = vmatpush3.msra.mxu0 %v2066_v22 }
 0x307   :  { %3511 = vmatprep.subr.mxu1 %v3987_v17  ;;  %3525 = vmatprep.subr.mxu0 %v2073_v26 }
 0x308   :  { %3492 = vmatprep.mubr.f32.mxu1 %v3810_v50  ;;  %3512 = vmatpush3.msra.mxu1 %v3987_v17 }
 0x309   :  { %3526 = vmatpush3.msra.mxu0 %v2073_v26  ;;  %3493 = vmatmul.mubr.f32.gmra.mxu1 %v3815_v54 }
 0x30a   :  { %3513 = vmatprep.subr.mxu1 %v3980_v12  ;;  %3527 = vmatprep.subr.mxu0 %v2080_v24 }
 0x30b   :  { %3506 = vmatprep.mubr.f32.mxu0 %v3820_v57  ;;  %3514 = vmatpush3.msra.mxu1 %v3980_v12 }
 0x30c   :  { %3528 = vmatpush3.msra.mxu0 %v2080_v24  ;;  %3515 = vmatprep.subr.mxu1 %v3982_v14 }
 0x30d   :  { %3507 = vmatmul.mubr.f32.gmra.mxu0 %v3828_v61  ;;  %3529 = vmatprep.subr.mxu0 %v2087_v27 }
 0x30e   :  { %3516 = vmatpush3.msra.mxu1 %v3982_v14  ;;  %3517 = vmatprep.mubr.f32.mxu1 %v3789_v49 }
 0x30f   :  { %3530 = vmatpush3.msra.mxu0 %v2087_v27  ;;  %3518 = vmatmul.mubr.f32.vlgmr.msra.gmra.mxu1 %v3823_v58 }
 0x310   :  { %3537 = vmatprep.subr.mxu1 %v3984_v15  ;;  %3531 = vmatprep.mubr.f32.mxu0 %v3782_v47 }
 0x311   :  { %3538 = vmatpush3.msra.mxu1 %v3984_v15  ;;  %3532 = vmatmul.mubr.f32.vlgmr.msra.gmra.mxu0 %v3806_v44  ;;  %v35_v15 = vld [vmem:[%s4130_s5] sm:$0x3] }
 0x312   :  { %3539 = vmatprep.subr.mxu1 %v3987_v17  ;;  %3520 = vmatprep.mubr.f32.mxu1 %v3833_v0  ;;  %v2554_v20 = vsel %vm681_vm2, %v35_v15, 0 }
 0x313   :  { %3540 = vmatpush3.msra.mxu1 %v3987_v17  ;;  %3534 = vmatprep.mubr.f32.mxu0 %v3810_v50  ;;  %v4052_v22 = vand.u32 4294901760, %v2554_v20 }
 0x314   :  { %3521 = vmatmul.mubr.f32.gmra.mxu1 %v3844_v5  ;;  %3541 = vmatprep.subr.mxu1 %v3980_v12 }
 0x315   :  { %3542 = vmatpush3.msra.mxu1 %v3980_v12  ;;  %3535 = vmatmul.mubr.f32.gmra.mxu0 %v3815_v54  ;;  %v4055_v23 = vsub.f32 %v2554_v20, %v4052_v22 }
 0x316   :  { %3543 = vmatprep.subr.mxu1 %v3982_v14  ;;  %3545 = vmatprep.mubr.f32.mxu1 %v3782_v47 }
 0x317   :  { %3544 = vmatpush3.msra.mxu1 %v3982_v14  ;;  %3551 = vmatprep.subr.mxu0 %v3657_v48  ;;  %v2627_v27 = vand.u32 4294901760, %v4055_v23 }
 0x318   :  { %3546 = vmatmul.mubr.f32.vlgmr.msra.gmra.mxu1 %v3806_v44  ;;  %3562 = vmatprep.subr.mxu1 %v3657_v48 }
 0x319   :  { %3548 = vmatprep.mubr.f32.mxu1 %v3810_v50  ;;  %3559 = vmatprep.mubr.msk.f32.mxu0 %vm3658_vm3, %v3657_v48  ;;  %v2628_v35 = vsub.f32 %v4055_v23, %v2627_v27 }
 0x31c   :  { %3549 = vmatmul.mubr.f32.gmra.mxu1 %v3815_v54 }
 0x31d   :  { %3570 = vmatprep.mubr.msk.f32.mxu1 %vm3658_vm3, %v3657_v48 }
 0x3ba   :  { %v3477_v47 = vpop.f32.mrf.mxu0 }
 0x3bb   :  { %v2016_v0 = vadd.f32 %v3477_v47, %v3908_v36 }
 0x3bc   :  { %v2005_v49 = vpop.f32.mrf.mxu0 }
 0x3bd   :  { %v2006_v11 = vadd.f32 %v2005_v49, %v3911_v39 }
 0x3bf   :  { %v3480_v52 = vpop.f32.mrf.mxu0 }
 0x3c0   :  { %v2036_v38 = vadd.f32 %v3480_v52, %v3904_v30 }
 0x3c1   :  { %v2025_v44 = vpop.f32.mrf.mxu0 }
 0x3c2   :  { %v2026_v43 = vadd.f32 %v2025_v44, %v3906_v33 }
 0x3c3   :  { %v3491_v57 = vpop.f32.mrf.mxu1 }
 0x3c4   :  { %v2133_v18 = vadd.f32 %v3491_v57, %v2016_v0 }
 0x3c5   :  { %v2126_v50 = vpop.f32.mrf.mxu1  ;;  %v3505_v58 = vpop.f32.mrf.mxu0 }
 0x3c6   :  { %v2127_v40 = vadd.f32 %v2126_v50, %v2006_v11  ;;  %v2232_v45 = vadd.f32 %v3505_v58, %v2133_v18  ;;  %v2629_v50 = vand.u32 4294901760, %v2628_v35 }
 0x3c7   :  { %v2224_v61 = vpop.f32.mrf.mxu0 }
 0x3c8   :  { %v2225_v56 = vadd.f32 %v2224_v61, %v2127_v40 }
 0x3c9   :  { %v3494_v54 = vpop.f32.mrf.mxu1 }
 0x3ca   :  { %v2145_v46 = vadd.f32 %v3494_v54, %v2036_v38 }
 0x3cb   :  { %v2138_v5 = vpop.f32.mrf.mxu1 }
 0x3cc   :  { %v2139_v59 = vadd.f32 %v2138_v5, %v2026_v43 }
 0x3cd   :  { %v3508_v21 = vpop.f32.mrf.mxu0 }
 0x3ce   :  { %v2246_v63 = vadd.f32 %v3508_v21, %v2145_v46 }
 0x3cf   :  { %v2238_v41 = vpop.f32.mrf.mxu0  ;;  %v3519_v42 = vpop.f32.mrf.mxu1 }
 0x3d0   :  { %v2331_v60 = vadd.f32 %v3519_v42, %v2232_v45  ;;  %v2239_v3 = vadd.f32 %v2238_v41, %v2139_v59 }
 0x3d1   :  { %v2322_v53 = vpop.f32.mrf.mxu1  ;;  %v3533_v55 = vpop.f32.mrf.mxu0 }
 0x3d2   :  { %v2323_v39 = vadd.f32 %v2322_v53, %v2225_v56  ;;  %v2436_v30 = vadd.f32 %v3533_v55, %v2331_v60  ;;  %v2551_v53 = vpop.permute.xlu0 %2550 }
 0x3d3   :  { %v2429_v36 = vpop.f32.mrf.mxu0 }
 0x3d4   :  { %v3522_v62 = vpop.f32.mrf.mxu1  ;;  %v2430_v7 = vadd.f32 %v2429_v36, %v2323_v39 }
 0x3d5   :  { %v3536_v2 = vpop.f32.mrf.mxu0  ;;  %v2347_v4 = vadd.f32 %v3522_v62, %v2246_v63 }
 0x3d6   :  { %v2338_v1 = vpop.f32.mrf.mxu1 }
 0x3d7   :  { %v2339_v8 = vadd.f32 %v2338_v1, %v2239_v3  ;;  %v2441_v9 = vpop.f32.mrf.mxu0  ;;  %v2448_v12 = vadd.f32 %v3536_v2, %v2347_v4 }
 0x3d8   :  { %v3547_v6 = vpop.f32.mrf.mxu1 }
 0x3d9   :  { %v2529_v33 = vadd.f32 %v3547_v6, %v2436_v30  ;;  %v2442_v16 = vadd.f32 %v2441_v9, %v2339_v8 }
 0x3da   :  { %v2522_v10 = vpop.f32.mrf.mxu1 }
 0x3db   :  { %3646 = vtanh.f32 %v2529_v33  ;;  %v2523_v13 = vadd.f32 %v2522_v10, %v2430_v7 }
 0x3dc   :  { %v3550_v14 = vpop.f32.mrf.mxu1 }
 0x3dd   :  { %3648 = vtanh.f32 %v2523_v13  ;;  %v2541_v51 = vadd.f32 %v3550_v14, %v2448_v12 }
 0x3de   :  { %v2534_v17 = vpop.f32.mrf.mxu1 }
 0x3df   :  { %3650 = vtanh.f32 %v2541_v51  ;;  %v2535_v19 = vadd.f32 %v2534_v17, %v2442_v16 }
 0x3e1   :  { %3652 = vtanh.f32 %v2535_v19 }
 0x3e8   :  { %v3647_v24 = vpop.eup %3646 }
 0x3e9   :  { %v4057_v25 = vand.u32 4294901760, %v3647_v24 }
 0x3ea   :  { %v3649_v26 = vpop.eup %3648 }
 0x3eb   :  { %v4060_v28 = vand.u32 4294901760, %v3649_v26  ;;  %v2675_v32 = vsub.f32 %v3647_v24, %v4057_v25 }
 0x3ec   :  { %v3651_v29 = vpop.eup %3650 }
 0x3ed   :  { %v4062_v31 = vand.u32 4294901760, %v3651_v29  ;;  %v2682_v49 = vsub.f32 %v3649_v26, %v4060_v28  ;;  %v2676_v57 = vand.u32 4294901760, %v2675_v32 }
 0x3ee   :  { %v3653_v34 = vpop.eup %3652 }
 0x3ef   :  { %3552 = vmatpush3.msra.mxu0 %v4062_v31  ;;  %v4069_v37 = vand.u32 4294901760, %v3653_v34  ;;  %v2661_v47 = vsub.f32 %v3651_v29, %v4062_v31  ;;  %v2683_v61 = vand.u32 4294901760, %v2682_v49  ;;  %v2677_v11 = vsub.f32 %v2675_v32, %v2676_v57 }
 0x3f0   :  { %3553 = vmatprep.subr.mxu0 %v3657_v48 }
 0x3f1   :  { %3554 = vmatpush3.msra.mxu0 %v4069_v37  ;;  %v2662_v52 = vand.u32 4294901760, %v2661_v47  ;;  %v2668_v44 = vsub.f32 %v3653_v34, %v4069_v37  ;;  %v2684_v21 = vsub.f32 %v2682_v49, %v2683_v61  ;;  %v2678_v38 = vand.u32 4294901760, %v2677_v11 }
 0x3f2   :  { %3555 = vmatprep.subr.mxu0 %v3657_v48 }
 0x3f3   :  { %3556 = vmatpush3.msra.mxu0 %v4057_v25  ;;  %v2663_v58 = vsub.f32 %v2661_v47, %v2662_v52  ;;  %v2669_v54 = vand.u32 4294901760, %v2668_v44  ;;  %v2685_v40 = vand.u32 4294901760, %v2684_v21 }
 0x3f4   :  { %3557 = vmatprep.subr.mxu0 %v3657_v48 }
 0x3f5   :  { %3558 = vmatpush3.msra.mxu0 %v4060_v28  ;;  %v2664_v0 = vand.u32 4294901760, %v2663_v58  ;;  %v2670_v5 = vsub.f32 %v2668_v44, %v2669_v54 }
 0x3f6   :  { %3560 = vmatmul.mubr.f32.vlgmr.msra.gmra.mxu0 %v2629_v50  ;;  %3573 = vmatprep.subr.mxu0 %v3657_v48 }
 0x3f7   :  { %3563 = vmatpush3.msra.mxu1 %v2664_v0  ;;  %3574 = vmatpush3.msra.mxu0 %v2661_v47  ;;  %v2671_v18 = vand.u32 4294901760, %v2670_v5 }
 0x3f8   :  { %3564 = vmatprep.subr.mxu1 %v3657_v48  ;;  %3575 = vmatprep.subr.mxu0 %v3657_v48 }
 0x3f9   :  { %3565 = vmatpush3.msra.mxu1 %v2671_v18  ;;  %3576 = vmatpush3.msra.mxu0 %v2668_v44 }
 0x3fa   :  { %3566 = vmatprep.subr.mxu1 %v3657_v48  ;;  %3577 = vmatprep.subr.mxu0 %v3657_v48 }
 0x3fb   :  { %3567 = vmatpush3.msra.mxu1 %v2678_v38  ;;  %3578 = vmatpush3.msra.mxu0 %v2675_v32 }
 0x3fc   :  { %3568 = vmatprep.subr.mxu1 %v3657_v48  ;;  %3579 = vmatprep.subr.mxu0 %v3657_v48 }
 0x3fd   :  { %3569 = vmatpush3.msra.mxu1 %v2685_v40  ;;  %3580 = vmatpush3.msra.mxu0 %v2682_v49 }
 0x3fe   :  { %3571 = vmatmul.mubr.f32.vlgmr.msra.gmra.mxu1 %v4052_v22  ;;  %3581 = vmatprep.mubr.msk.f32.mxu0 %vm3658_vm3, %v3657_v48 }
 0x3ff   :  { %3584 = vmatprep.subr.mxu1 %v3657_v48  ;;  %3595 = vmatprep.subr.mxu0 %v3657_v48 }
 0x400   :  { %3582 = vmatmul.mubr.f32.vlgmr.msra.gmra.mxu0 %v4055_v23  ;;  %3585 = vmatpush3.msra.mxu1 %v4062_v31 }
 0x401   :  { %3596 = vmatpush3.msra.mxu0 %v2662_v52  ;;  %3586 = vmatprep.subr.mxu1 %v3657_v48 }
 0x402   :  { %3597 = vmatprep.subr.mxu0 %v3657_v48  ;;  %3587 = vmatpush3.msra.mxu1 %v4069_v37 }
 0x403   :  { %3598 = vmatpush3.msra.mxu0 %v2669_v54  ;;  %3588 = vmatprep.subr.mxu1 %v3657_v48 }
 0x404   :  { %3599 = vmatprep.subr.mxu0 %v3657_v48  ;;  %3589 = vmatpush3.msra.mxu1 %v4057_v25 }
 0x405   :  { %3600 = vmatpush3.msra.mxu0 %v2676_v57  ;;  %3590 = vmatprep.subr.mxu1 %v3657_v48 }
 0x406   :  { %3601 = vmatprep.subr.mxu0 %v3657_v48  ;;  %3591 = vmatpush3.msra.mxu1 %v4060_v28 }
 0x407   :  { %3592 = vmatprep.mubr.msk.f32.mxu1 %vm3658_vm3, %v3657_v48  ;;  %3602 = vmatpush3.msra.mxu0 %v2683_v61 }
 0x408   :  { %3593 = vmatmul.mubr.f32.vlgmr.msra.gmra.mxu1 %v2627_v27  ;;  %3606 = vmatprep.subr.mxu1 %v3657_v48 }
 0x409   :  { %3603 = vmatprep.mubr.msk.f32.mxu0 %vm3658_vm3, %v3657_v48  ;;  %3607 = vmatpush3.msra.mxu1 %v4062_v31 }
 0x40a   :  { %3604 = vmatmul.mubr.f32.vlgmr.msra.gmra.mxu0 %v4052_v22  ;;  %3608 = vmatprep.subr.mxu1 %v3657_v48 }
 0x40b   :  { %3609 = vmatpush3.msra.mxu1 %v4069_v37  ;;  %3614 = vmatprep.mubr.msk.f32.mxu1 %vm3658_vm3, %v3657_v48 }
 0x40c   :  { %3610 = vmatprep.subr.mxu1 %v3657_v48 }
 0x40d   :  { %3611 = vmatpush3.msra.mxu1 %v4057_v25 }
 0x40e   :  { %3612 = vmatprep.subr.mxu1 %v3657_v48 }
 0x40f   :  { %3613 = vmatpush3.msra.mxu1 %v4060_v28 }
 0x410   :  { %3615 = vmatmul.mubr.f32.vlgmr.msra.gmra.mxu1 %v4052_v22 }
 0x4b6   :  { %v2631_v41 = vpop.f32.mrf.mxu0 }
 0x4b7   :  { %v2632_v56 = vadd.f32 %v2631_v41, %v2551_v53 }
 0x4b8   :  { %v3561_v42 = vpop.f32.mrf.mxu0 }
 0x4be   :  { %v2722_v43 = vpop.f32.mrf.mxu1 }
 0x4bf   :  { %v2723_v59 = vadd.f32 %v2722_v43, %v2632_v56 }
 0x4c0   :  { %v3572_v45 = vpop.f32.mrf.mxu1  ;;  %v2802_v46 = vpop.f32.mrf.mxu0 }
 0x4c1   :  { %v2803_v36 = vadd.f32 %v2802_v46, %v2723_v59 }
 0x4c2   :  { %v3583_v55 = vpop.f32.mrf.mxu0 }
 0x4c8   :  { %v2879_v60 = vpop.f32.mrf.mxu1 }
 0x4c9   :  { %v2880_v39 = vadd.f32 %v2879_v60, %v2803_v36 }
 0x4ca   :  { %v3594_v62 = vpop.f32.mrf.mxu1  ;;  %v2962_v63 = vpop.f32.mrf.mxu0 }
 0x4cb   :  { %v2963_v48 = vadd.f32 %v2962_v63, %v2880_v39 }
 0x4cc   :  { %v3605_v1 = vpop.f32.mrf.mxu0 }
 0x4d0   :  { %v3037_v2 = vpop.f32.mrf.mxu1 }
 0x4d1   :  { %v3038_v3 = vadd.f32 %v3037_v2, %v2963_v48 }
 0x4d2   :  { %v3616_v30 = vpop.f32.mrf.mxu1 }
 0x4d3   :  { %3654 = vtanh.f32 %v3038_v3 }
 0x4e0   :  { %v3655_v4 = vpop.eup %3654 }
 0x4e1   :  { %3042 = vst [vmem:[%s4131_s7] sm:$0x3] %v3655_v4 }

</bundles_post_ra>
